<compile_context>
chip_gen: v7x
topology: tpu7x:2x2x1
jax: 0.10.0
libtpu: 0.0.40
codegen_flags: <defaults>
</compile_context>

<pallas_src>
import jax
import jax.numpy as jnp
from jax.experimental import pallas as pl
from jax.experimental.pallas import tpu as pltpu
import numpy as np

LANE = 128                       # TPU lane width
_TILE_CANDIDATES = (4096, 2048, 1024, 512, 256, 128)


def erm_mlp_kernel(x_ref, w0_ref, b0_ref, w1_ref, b1_ref, wfc_ref, bfc_ref, o_ref):
    # featurizer.input: Linear(n_inputs, W) -> (dropout=id) -> ReLU
    x = x_ref[...].astype(jnp.bfloat16)                 # in-kernel cast; x is f32 in HBM
    h = jnp.dot(x, w0_ref[...], preferred_element_type=jnp.float32)
    h = jnp.maximum(h + b0_ref[...], 0.0)               # f32 bias + ReLU
    # featurizer.hiddens[0]: Linear(W, W) -> (dropout=id) -> ReLU
    h = jnp.dot(h.astype(jnp.bfloat16), w1_ref[...],
                preferred_element_type=jnp.float32)
    h = jnp.maximum(h + b1_ref[...], 0.0)
    # folded [featurizer.output ; classifier]: Linear(W, Cp).  No nonlinearity
    # sits between them in the original network, so Wfc = w2 @ wc,
    # bfc = b2 @ wc + bc is exact algebra (done in f32 in prepare_params).
    logits = jnp.dot(h.astype(jnp.bfloat16), wfc_ref[...],
                     preferred_element_type=jnp.float32) + bfc_ref[...]
    # Store only the live classifier columns: unpadded (tb, C) output block,
    # 16x less HBM writeback than a 128-lane padded f32 slab.
    c = o_ref.shape[-1]
    o_ref[...] = logits[:, :c].astype(o_ref.dtype)


def _choose_tb(B):
    """Batch tile: a multiple of 128, big enough to amortize the ~0.35us
    per-grid-step overhead, small enough to keep >=2 (>=4 for larger batches)
    grid steps so the batch axis shards across v7x's two TensorCores."""
    if B <= LANE:
        return LANE
    steps_target = 4 if B >= 4 * LANE else 2
    cap = max(LANE, (B // steps_target) // LANE * LANE)
    for t in _TILE_CANDIDATES:
        if t <= cap:
            return t
    return LANE


def prepare_params(params):
    """Fold w2/wc, pad the folded classifier weight to 128 lanes (full MXU
    tile; padded columns are zero and never stored), cast weights to bf16."""
    w2, wc = params["w2"], params["wc"]
    b2, bc = params["b2"], params["bc"]
    C = wc.shape[1]
    Cp = max(LANE, ((C + LANE - 1) // LANE) * LANE)
    wfc = jnp.dot(w2, wc, preferred_element_type=jnp.float32)        # (W, C)
    bfc = jnp.dot(b2, wc, preferred_element_type=jnp.float32) + bc   # (1, C)
    wfc = jnp.pad(wfc, ((0, 0), (0, Cp - C)))
    bfc = jnp.pad(bfc, ((0, 0), (0, Cp - C)))
    return dict(
        w0=params["w0"].astype(jnp.bfloat16),
        b0=params["b0"].astype(jnp.float32),
        w1=params["w1"].astype(jnp.bfloat16),
        b1=params["b1"].astype(jnp.float32),
        wfc=wfc.astype(jnp.bfloat16),
        bfc=bfc.astype(jnp.float32),
        num_classes=C,
    )


def erm_forward(x, p, *, tb=None):
    B, n_in = x.shape
    W = p["w0"].shape[1]
    Cp = p["wfc"].shape[1]
    C = p["num_classes"]

    tb = _choose_tb(B) if tb is None else tb
    assert tb % 8 == 0, "batch tile must be sublane (8) aligned"
    B_pad = ((B + tb - 1) // tb) * tb
    x_in = x if B_pad == B else jnp.pad(x, ((0, B_pad - B), (0, 0)))

    out = pl.pallas_call(
        erm_mlp_kernel,
        out_shape=jax.ShapeDtypeStruct((B_pad, C), jnp.float32),
        grid_spec=pltpu.PrefetchScalarGridSpec(
            num_scalar_prefetch=0,
            grid=(B_pad // tb,),
            in_specs=[
                pl.BlockSpec((tb, n_in), lambda i: (i, 0)),   # x batch tile (f32)
                pl.BlockSpec((n_in, W),  lambda i: (0, 0)),   # featurizer.input.weight.T (bf16)
                pl.BlockSpec((1, W),     lambda i: (0, 0)),   # featurizer.input.bias (f32)
                pl.BlockSpec((W, W),     lambda i: (0, 0)),   # featurizer.hiddens[0].weight.T (bf16)
                pl.BlockSpec((1, W),     lambda i: (0, 0)),   # featurizer.hiddens[0].bias (f32)
                pl.BlockSpec((W, Cp),    lambda i: (0, 0)),   # folded (output @ classifier) weight (bf16)
                pl.BlockSpec((1, Cp),    lambda i: (0, 0)),   # folded bias (f32)
            ],
            out_specs=pl.BlockSpec((tb, C), lambda i: (i, 0)),   # unpadded (tb, C) logits
        ),
        compiler_params=pltpu.CompilerParams(dimension_semantics=("parallel",)),
    )(x_in, p["w0"], p["b0"], p["w1"], p["b1"], p["wfc"], p["bfc"])

    return out if B_pad == B else out[:B]


def init_params(key, n_in, width, n_classes):
    """Deterministic PyTorch-Linear-style init: U(-1/sqrt(fan_in), 1/sqrt(fan_in))."""
    def linear(k, fan_in, fan_out):
        kw, kb = jax.random.split(k)
        bound = 1.0 / np.sqrt(fan_in)
        w = jax.random.uniform(kw, (fan_in, fan_out), jnp.float32, -bound, bound)
        b = jax.random.uniform(kb, (1, fan_out), jnp.float32, -bound, bound)
        return w, b

    k0, k1, k2, kc = jax.random.split(key, 4)
    w0, b0 = linear(k0, n_in, width)
    w1, b1 = linear(k1, width, width)
    w2, b2 = linear(k2, width, width)
    wc, bc = linear(kc, width, n_classes)
    return dict(w0=w0, b0=b0, w1=w1, b1=b1, w2=w2, b2=b2, wc=wc, bc=bc)


def erm_forward_ref(x, p):
    """Pure-f32 reference matching the original PyTorch forward semantics."""
    h = jnp.maximum(x @ p["w0"] + p["b0"], 0.0)
    h = jnp.maximum(h @ p["w1"] + p["b1"], 0.0)
    feat = h @ p["w2"] + p["b2"]
    return feat @ p["wc"] + p["bc"]


# TODO(synk): ERM.update() (cross-entropy loss + Adam step) is a training loop,
# not part of forward(); only the forward/predict path is implemented here.

if __name__ == "__main__":
    B, N_IN, WIDTH, N_CLASSES = 8, 32, 128, 8

    key = jax.random.PRNGKey(0)
    kx, kp = jax.random.split(key)
    x = jax.random.normal(kx, (B, N_IN), dtype=jnp.float32)
    params = init_params(kp, N_IN, WIDTH, N_CLASSES)
    prepared = prepare_params(params)

    out = jax.block_until_ready(erm_forward(x, prepared))
    ref = jax.block_until_ready(erm_forward_ref(x, params))

    assert out.shape == ref.shape, (out.shape, ref.shape)
    # bf16 operands (f32 accumulation) => loosen tolerance vs the f32 reference.
    np.testing.assert_allclose(np.asarray(out), np.asarray(ref), rtol=3e-2, atol=3e-2)

    print("KERNEL_OK")
</pallas_src>

<mosaic_0001>
module attributes {stable_mosaic.version = 11 : i64} {
  func.func @erm_mlp_kernel(%arg0: i32, %arg1: memref<128x32xf32, #tpu.memory_space<vmem>>, %arg2: memref<32x128xbf16, #tpu.memory_space<vmem>>, %arg3: memref<1x128xf32, #tpu.memory_space<vmem>>, %arg4: memref<128x128xbf16, #tpu.memory_space<vmem>>, %arg5: memref<1x128xf32, #tpu.memory_space<vmem>>, %arg6: memref<128x128xbf16, #tpu.memory_space<vmem>>, %arg7: memref<1x128xf32, #tpu.memory_space<vmem>>, %arg8: memref<128x8xf32, #tpu.memory_space<vmem>>) attributes {dimension_semantics = [#tpu.dimension_semantics<parallel>], iteration_bounds = array<i64: 1>, scalar_prefetch = 0 : i64, scratch_operands = 0 : i64, tpu.core_type = #tpu.core_type<tc>, window_params = [{transform_indices = @transform_0, window_bounds = array<i64: 128, 32>}, {pipeline_mode = #tpu.pipeline_mode<synchronous>, transform_indices = @transform_1, window_bounds = array<i64: 32, 128>}, {pipeline_mode = #tpu.pipeline_mode<synchronous>, transform_indices = @transform_2, window_bounds = array<i64: 1, 128>}, {pipeline_mode = #tpu.pipeline_mode<synchronous>, transform_indices = @transform_3, window_bounds = array<i64: 128, 128>}, {pipeline_mode = #tpu.pipeline_mode<synchronous>, transform_indices = @transform_4, window_bounds = array<i64: 1, 128>}, {pipeline_mode = #tpu.pipeline_mode<synchronous>, transform_indices = @transform_5, window_bounds = array<i64: 128, 128>}, {pipeline_mode = #tpu.pipeline_mode<synchronous>, transform_indices = @transform_6, window_bounds = array<i64: 1, 128>}, {transform_indices = @transform_7, window_bounds = array<i64: 128, 8>}]} {
    %c0 = arith.constant 0 : index
    %c0_0 = arith.constant 0 : index
    %0 = vector.load %arg1[%c0, %c0_0] : memref<128x32xf32, #tpu.memory_space<vmem>>, vector<128x32xf32>
    %1 = arith.truncf %0 : vector<128x32xf32> to vector<128x32xbf16>
    %c0_1 = arith.constant 0 : index
    %c0_2 = arith.constant 0 : index
    %2 = vector.load %arg2[%c0_1, %c0_2] : memref<32x128xbf16, #tpu.memory_space<vmem>>, vector<32x128xbf16>
    %cst = arith.constant dense<0.000000e+00> : vector<128x128xf32>
    %3 = tpu.matmul %1, %2, %cst {dimension_numbers = #tpu.dot_dimension_numbers<[1], [0], [0], [1], [0, 0, 1, 1], [], []>} : vector<128x32xbf16>, vector<32x128xbf16>, vector<128x128xf32> -> vector<128x128xf32>
    %c0_3 = arith.constant 0 : index
    %c0_4 = arith.constant 0 : index
    %4 = vector.load %arg3[%c0_3, %c0_4] : memref<1x128xf32, #tpu.memory_space<vmem>>, vector<1x128xf32>
    %5 = vector.broadcast %4 : vector<1x128xf32> to vector<128x128xf32>
    %6 = arith.addf %3, %5 : vector<128x128xf32>
    %cst_5 = arith.constant 0.000000e+00 : f32
    %7 = vector.broadcast %cst_5 : f32 to vector<128x128xf32>
    %8 = arith.maximumf %6, %7 : vector<128x128xf32>
    %9 = arith.truncf %8 : vector<128x128xf32> to vector<128x128xbf16>
    %c0_6 = arith.constant 0 : index
    %c0_7 = arith.constant 0 : index
    %10 = vector.load %arg4[%c0_6, %c0_7] : memref<128x128xbf16, #tpu.memory_space<vmem>>, vector<128x128xbf16>
    %cst_8 = arith.constant dense<0.000000e+00> : vector<128x128xf32>
    %11 = tpu.matmul %9, %10, %cst_8 {dimension_numbers = #tpu.dot_dimension_numbers<[1], [0], [0], [1], [0, 0, 1, 1], [], []>} : vector<128x128xbf16>, vector<128x128xbf16>, vector<128x128xf32> -> vector<128x128xf32>
    %c0_9 = arith.constant 0 : index
    %c0_10 = arith.constant 0 : index
    %12 = vector.load %arg5[%c0_9, %c0_10] : memref<1x128xf32, #tpu.memory_space<vmem>>, vector<1x128xf32>
    %13 = vector.broadcast %12 : vector<1x128xf32> to vector<128x128xf32>
    %14 = arith.addf %11, %13 : vector<128x128xf32>
    %cst_11 = arith.constant 0.000000e+00 : f32
    %15 = vector.broadcast %cst_11 : f32 to vector<128x128xf32>
    %16 = arith.maximumf %14, %15 : vector<128x128xf32>
    %17 = arith.truncf %16 : vector<128x128xf32> to vector<128x128xbf16>
    %c0_12 = arith.constant 0 : index
    %c0_13 = arith.constant 0 : index
    %18 = vector.load %arg6[%c0_12, %c0_13] : memref<128x128xbf16, #tpu.memory_space<vmem>>, vector<128x128xbf16>
    %cst_14 = arith.constant dense<0.000000e+00> : vector<128x128xf32>
    %19 = tpu.matmul %17, %18, %cst_14 {dimension_numbers = #tpu.dot_dimension_numbers<[1], [0], [0], [1], [0, 0, 1, 1], [], []>} : vector<128x128xbf16>, vector<128x128xbf16>, vector<128x128xf32> -> vector<128x128xf32>
    %c0_15 = arith.constant 0 : index
    %c0_16 = arith.constant 0 : index
    %20 = vector.load %arg7[%c0_15, %c0_16] : memref<1x128xf32, #tpu.memory_space<vmem>>, vector<1x128xf32>
    %21 = vector.broadcast %20 : vector<1x128xf32> to vector<128x128xf32>
    %22 = arith.addf %19, %21 : vector<128x128xf32>
    %23 = vector.extract_strided_slice %22 {offsets = [0, 0], sizes = [128, 8], strides = [1, 1]} : vector<128x128xf32> to vector<128x8xf32>
    %c0_17 = arith.constant 0 : index
    %c0_18 = arith.constant 0 : index
    %24 = vector.load %arg8[%c0_17, %c0_18] : memref<128x8xf32, #tpu.memory_space<vmem>>, vector<128x8xf32>
    tpu.vector_store %arg8[%c0_17, %c0_18], %23 {strides = array<i32>} : memref<128x8xf32, #tpu.memory_space<vmem>>, vector<128x8xf32>,
    return
  }
  func.func @transform_0(%arg0: i32) -> (i32, i32) {
    %c0_i32 = arith.constant 0 : i32
    %c0_i32_0 = arith.constant 0 : i32
    return %arg0, %c0_i32 : i32, i32
  }
  func.func @transform_1(%arg0: i32) -> (i32, i32) {
    %c0_i32 = arith.constant 0 : i32
    %c0_i32_0 = arith.constant 0 : i32
    %c0_i32_1 = arith.constant 0 : i32
    return %c0_i32, %c0_i32_0 : i32, i32
  }
  func.func @transform_2(%arg0: i32) -> (i32, i32) {
    %c0_i32 = arith.constant 0 : i32
    %c0_i32_0 = arith.constant 0 : i32
    %c0_i32_1 = arith.constant 0 : i32
    return %c0_i32, %c0_i32_0 : i32, i32
  }
  func.func @transform_3(%arg0: i32) -> (i32, i32) {
    %c0_i32 = arith.constant 0 : i32
    %c0_i32_0 = arith.constant 0 : i32
    %c0_i32_1 = arith.constant 0 : i32
    return %c0_i32, %c0_i32_0 : i32, i32
  }
  func.func @transform_4(%arg0: i32) -> (i32, i32) {
    %c0_i32 = arith.constant 0 : i32
    %c0_i32_0 = arith.constant 0 : i32
    %c0_i32_1 = arith.constant 0 : i32
    return %c0_i32, %c0_i32_0 : i32, i32
  }
  func.func @transform_5(%arg0: i32) -> (i32, i32) {
    %c0_i32 = arith.constant 0 : i32
    %c0_i32_0 = arith.constant 0 : i32
    %c0_i32_1 = arith.constant 0 : i32
    return %c0_i32, %c0_i32_0 : i32, i32
  }
  func.func @transform_6(%arg0: i32) -> (i32, i32) {
    %c0_i32 = arith.constant 0 : i32
    %c0_i32_0 = arith.constant 0 : i32
    %c0_i32_1 = arith.constant 0 : i32
    return %c0_i32, %c0_i32_0 : i32, i32
  }
  func.func @transform_7(%arg0: i32) -> (i32, i32) {
    %c0_i32 = arith.constant 0 : i32
    %c0_i32_0 = arith.constant 0 : i32
    return %arg0, %c0_i32 : i32, i32
  }
}

</mosaic_0001>

<bundles_post_ra>
// kernel: tpu_custom_call.1
= control target key start
LH: loop header
LB: loop body
LE: loop exit
PB: predicated region body
PF: predicated region fallthrough
CT: control target
= control target key end

     0   :  { %vm74_vm0 = vcmask 261120   ;;  %vm580_vm1 = vcmask 64512   ;;  %s997_s1 = inlined_call_operand.vmem [shape: bf16[32,128], index: 1, kind: input, shape index: {}]   ;;  %s998_s0 = inlined_call_operand.vmem [shape: f32[128,32], index: 0, kind: input, shape index: {}]   ;;  %s999_s3 = inlined_call_operand.vmem [shape: bf16[128,128], index: 3, kind: input, shape index: {}]   ;;  %s1000_s5 = inlined_call_operand.vmem [shape: bf16[128,128], index: 5, kind: input, shape index: {}]   ;;  %s1001_s2 = inlined_call_operand.vmem [shape: f32[1,128], index: 2, kind: input, shape index: {}]   ;;  %s1002_s4 = inlined_call_operand.vmem [shape: f32[1,128], index: 4, kind: input, shape index: {}]   ;;  %s1003_s6 = inlined_call_operand.vmem [shape: f32[1,128], index: 6, kind: input, shape index: {}]   ;;  %s1004_s7 = inlined_call_operand.vmem [shape: f32[128,8], index: 7, kind: output, shape index: {}]  }
   0x1   :  { %v756_v0 = vld [vmem:[%s997_s1] sm:$0xff]   ;;  %v757_v1 = vld [vmem:[%s997_s1 + $0x8] sm:$0xff]   ;;  %v29_v5 = vld [vmem:[%s998_s0 + $0x10] sm:$0xff] }
   0x2   :  { %672 = vmatprep.subr.bf16.mxu0 %v756_v0  ;;  %v27_v2 = vld [vmem:[%s998_s0] sm:$0xff]  ;;  %v28_v3 = vld [vmem:[%s998_s0 + $0x8] sm:$0xff]  ;;  %v30_v6 = vld [vmem:[%s998_s0 + $0x18] sm:$0xff] }
   0x3   :  { %673 = vmatpush3.bf16.msra.mxu0 %v756_v0  ;;  %v43_v4 = vpack.c.bf16 %v28_v3, %v27_v2  ;;  %v31_v7 = vld [vmem:[%s998_s0 + $0x20] sm:$0xff]  ;;  %v32_v8 = vld [vmem:[%s998_s0 + $0x28] sm:$0xff]  ;;  %v44_v9 = vpack.c.bf16 %v30_v6, %v29_v5  ;;  %v33_v12 = vld [vmem:[%s998_s0 + $0x30] sm:$0xff] }
   0x4   :  { %674 = vmatprep.subr.bf16.mxu0 %v757_v1  ;;  %v45_v10 = vpack.c.bf16 %v32_v8, %v31_v7  ;;  %v758_v11 = vld [vmem:[%s999_s3] sm:$0xff]   ;;  %v34_v13 = vld [vmem:[%s998_s0 + $0x38] sm:$0xff]  ;;  %v759_v14 = vld [vmem:[%s999_s3 + $0x8] sm:$0xff]  }
   0x5   :  { %676 = vmatprep.mubr.msk.bf16.mxu0 %vm74_vm0, %v43_v4  ;;  %v35_v15 = vld [vmem:[%s998_s0 + $0x40] sm:$0xff]  ;;  %692 = vmatprep.subr.bf16.mxu1 %v758_v11  ;;  %v36_v16 = vld [vmem:[%s998_s0 + $0x48] sm:$0xff]  ;;  %v760_v17 = vld [vmem:[%s999_s3 + $0x10] sm:$0xff]   ;;  %v46_v18 = vpack.c.bf16 %v34_v13, %v33_v12 }
   0x6   :  { %693 = vmatpush3.bf16.msra.mxu1 %v758_v11  ;;  %v47_v19 = vpack.c.bf16 %v36_v16, %v35_v15  ;;  %v761_v20 = vld [vmem:[%s999_s3 + $0x18] sm:$0xff]   ;;  %v37_v21 = vld [vmem:[%s998_s0 + $0x50] sm:$0xff]  ;;  %v39_v23 = vld [vmem:[%s998_s0 + $0x60] sm:$0xff] }
   0x7   :  { %675 = vmatpush3.bf16.msra.mxu0 %v757_v1  ;;  %694 = vmatprep.subr.bf16.mxu1 %v759_v14  ;;  %v38_v22 = vld [vmem:[%s998_s0 + $0x58] sm:$0xff]  ;;  %v40_v24 = vld [vmem:[%s998_s0 + $0x68] sm:$0xff]  ;;  %v762_v25 = vld [vmem:[%s999_s3 + $0x20] sm:$0xff]  }
   0x8   :  { %v48_v26 = vpack.c.bf16 %v38_v22, %v37_v21  ;;  %v49_v27 = vpack.c.bf16 %v40_v24, %v39_v23  ;;  %v763_v28 = vld [vmem:[%s999_s3 + $0x28] sm:$0xff]   ;;  %v41_v29 = vld [vmem:[%s998_s0 + $0x70] sm:$0xff]  ;;  %v42_v30 = vld [vmem:[%s998_s0 + $0x78] sm:$0xff] }
   0x9   :  { %v50_v31 = vpack.c.bf16 %v42_v30, %v41_v29  ;;  %v764_v32 = vld [vmem:[%s999_s3 + $0x30] sm:$0xff]   ;;  %v765_v33 = vld [vmem:[%s999_s3 + $0x38] sm:$0xff]   ;;  %v766_v34 = vld [vmem:[%s1000_s5] sm:$0xff]  }
   0xa   :  { %677 = vmatmul.mubr.msk.bf16.vlgmr.msra.gmra.mrb[0].mxu0 %vm74_vm0, %v44_v9  ;;  %695 = vmatpush3.bf16.msra.mxu1 %v759_v14  ;;  %v767_v35 = vld [vmem:[%s1000_s5 + $0x8] sm:$0xff]   ;;  %v768_v36 = vld [vmem:[%s1000_s5 + $0x10] sm:$0xff]   ;;  %v769_v37 = vld [vmem:[%s1000_s5 + $0x18] sm:$0xff]  }
   0xb   :  { %680 = vmatprep.mubr.msk.bf16.mxu0 %vm74_vm0, %v45_v10  ;;  %696 = vmatprep.subr.bf16.mxu1 %v760_v17  ;;  %v770_v38 = vld [vmem:[%s1000_s5 + $0x20] sm:$0xff]   ;;  %v771_v39 = vld [vmem:[%s1000_s5 + $0x28] sm:$0xff]  }
   0xc   :  { %724 = vmatprep.subr.bf16.mxu0 %v766_v34  ;;  %v601_v40 = vld [vmem:[%s1001_s2] ss:$0 sm:$0xff] }
   0xd   :  { %725 = vmatpush3.bf16.msra.mxu0 %v766_v34  ;;  %v773_v34 = vld [vmem:[%s1000_s5 + $0x38] sm:$0xff]  }
   0xe   :  { %697 = vmatpush3.bf16.msra.mxu1 %v760_v17  ;;  %726 = vmatprep.subr.bf16.mxu0 %v767_v35 }
   0xf   :  { %698 = vmatprep.subr.bf16.mxu1 %v761_v20 }
  0x11   :  { %727 = vmatpush3.bf16.msra.mxu0 %v767_v35  ;;  %v612_v35 = vld [vmem:[%s1002_s4] ss:$0 sm:$0xff] }
  0x12   :  { %681 = vmatmul.mubr.msk.bf16.gmra.mrb[4].mxu0 %vm74_vm0, %v46_v18  ;;  %699 = vmatpush3.bf16.msra.mxu1 %v761_v20 }
  0x13   :  { %684 = vmatprep.mubr.msk.bf16.mxu0 %vm74_vm0, %v47_v19  ;;  %700 = vmatprep.subr.bf16.mxu1 %v762_v25 }
  0x14   :  { %728 = vmatprep.subr.bf16.mxu0 %v768_v36 }
  0x15   :  { %729 = vmatpush3.bf16.msra.mxu0 %v768_v36 }
  0x16   :  { %701 = vmatpush3.bf16.msra.mxu1 %v762_v25  ;;  %730 = vmatprep.subr.bf16.mxu0 %v769_v37 }
  0x17   :  { %702 = vmatprep.subr.bf16.mxu1 %v763_v28 }
  0x19   :  { %731 = vmatpush3.bf16.msra.mxu0 %v769_v37 }
  0x1a   :  { %685 = vmatmul.mubr.msk.bf16.gmra.mrb[8].mxu0 %vm74_vm0, %v48_v26  ;;  %703 = vmatpush3.bf16.msra.mxu1 %v763_v28 }
  0x1b   :  { %688 = vmatprep.mubr.msk.bf16.mxu0 %vm74_vm0, %v49_v27  ;;  %704 = vmatprep.subr.bf16.mxu1 %v764_v32 }
  0x1c   :  { %732 = vmatprep.subr.bf16.mxu0 %v770_v38 }
  0x1d   :  { %733 = vmatpush3.bf16.msra.mxu0 %v770_v38 }
  0x1e   :  { %705 = vmatpush3.bf16.msra.mxu1 %v764_v32  ;;  %734 = vmatprep.subr.bf16.mxu0 %v771_v39 }
  0x1f   :  { %706 = vmatprep.subr.bf16.mxu1 %v765_v33 }
  0x21   :  { %735 = vmatpush3.bf16.msra.mxu0 %v771_v39 }
  0x22   :  { %689 = vmatmul.mubr.msk.bf16.gmra.mrb[12].mxu0 %vm74_vm0, %v50_v31  ;;  %707 = vmatpush3.bf16.msra.mxu1 %v765_v33  ;;  %v772_v33 = vld [vmem:[%s1000_s5 + $0x30] sm:$0xff]  }
  0x23   :  { %736 = vmatprep.subr.bf16.mxu0 %v772_v33 }
  0x25   :  { %737 = vmatpush3.bf16.msra.mxu0 %v772_v33 }
  0x26   :  { %738 = vmatprep.subr.bf16.mxu0 %v773_v34 }
  0x29   :  { %739 = vmatpush3.bf16.msra.mxu0 %v773_v34 }
  0xdd   :  { %v678_v41 = vpop.f32.mrb[0].mxu0 }
  0xde   :  { %v142_v42 = vadd.f32 %v678_v41, %v601_v40  ;;  %v133_v43 = vpop.f32.mrb[1].mxu0 }
  0xdf   :  { %v134_v44 = vadd.f32 %v601_v40, %v133_v43  ;;  %v679_v45 = vpop.f32.mrb[2].mxu0 }
  0xe0   :  { %v145_v46 = vadd.f32 %v679_v45, %v601_v40  ;;  %v136_v47 = vpop.f32.mrb[3].mxu0  ;;  %v198_v49 = vmax.f32 %v142_v42, 0.0 }
  0xe1   :  { %v137_v48 = vadd.f32 %v601_v40, %v136_v47  ;;  %v196_v51 = vmax.f32 %v134_v44, 0.0 }
  0xe2   :  { %v199_v50 = vmax.f32 %v145_v46, 0.0 }
  0xe3   :  { %v197_v52 = vmax.f32 %v137_v48, 0.0 }
  0xe4   :  { %v213_v53 = vpack.c.bf16 %v199_v50, %v198_v49 }
  0xe5   :  { %v682_v54 = vpop.f32.mrb[4].mxu0  ;;  %v212_v55 = vpack.c.bf16 %v197_v52, %v196_v51 }
  0xe6   :  { %v158_v56 = vadd.f32 %v682_v54, %v601_v40  ;;  %v149_v57 = vpop.f32.mrb[5].mxu0 }
  0xe7   :  { %v150_v58 = vadd.f32 %v601_v40, %v149_v57  ;;  %v683_v59 = vpop.f32.mrb[6].mxu0  ;;  %708 = vmatprep.mubr.bf16.mxu1 %v212_v55 }
  0xe8   :  { %v161_v60 = vadd.f32 %v683_v59, %v601_v40  ;;  %v152_v61 = vpop.f32.mrb[7].mxu0  ;;  %709 = vmatmul.mubr.bf16.vlgmr.msra.gmra.mrb[0].mxu1 %v213_v53  ;;  %v202_v63 = vmax.f32 %v158_v56, 0.0 }
  0xe9   :  { %v153_v62 = vadd.f32 %v601_v40, %v152_v61  ;;  %v200_v1 = vmax.f32 %v150_v58, 0.0 }
  0xea   :  { %v203_v0 = vmax.f32 %v161_v60, 0.0 }
  0xeb   :  { %v201_v2 = vmax.f32 %v153_v62, 0.0 }
  0xec   :  { %v215_v3 = vpack.c.bf16 %v203_v0, %v202_v63 }
  0xed   :  { %v214_v4 = vpack.c.bf16 %v201_v2, %v200_v1  ;;  %v686_v5 = vpop.f32.mrb[8].mxu0 }
  0xee   :  { %v174_v6 = vadd.f32 %v686_v5, %v601_v40  ;;  %v165_v7 = vpop.f32.mrb[9].mxu0 }
  0xef   :  { %v166_v8 = vadd.f32 %v601_v40, %v165_v7  ;;  %v687_v9 = vpop.f32.mrb[10].mxu0  ;;  %712 = vmatprep.mubr.bf16.mxu1 %v214_v4 }
  0xf0   :  { %v177_v10 = vadd.f32 %v687_v9, %v601_v40  ;;  %v168_v11 = vpop.f32.mrb[11].mxu0  ;;  %713 = vmatmul.mubr.bf16.gmra.mrb[4].mxu1 %v215_v3  ;;  %v206_v13 = vmax.f32 %v174_v6, 0.0 }
  0xf1   :  { %v169_v12 = vadd.f32 %v601_v40, %v168_v11  ;;  %v204_v15 = vmax.f32 %v166_v8, 0.0 }
  0xf2   :  { %v207_v14 = vmax.f32 %v177_v10, 0.0 }
  0xf3   :  { %v205_v16 = vmax.f32 %v169_v12, 0.0 }
  0xf4   :  { %v217_v17 = vpack.c.bf16 %v207_v14, %v206_v13 }
  0xf5   :  { %v216_v18 = vpack.c.bf16 %v205_v16, %v204_v15  ;;  %v690_v19 = vpop.f32.mrb[12].mxu0 }
  0xf6   :  { %v190_v20 = vadd.f32 %v690_v19, %v601_v40  ;;  %v181_v21 = vpop.f32.mrb[13].mxu0 }
  0xf7   :  { %v182_v22 = vadd.f32 %v601_v40, %v181_v21  ;;  %v691_v23 = vpop.f32.mrb[14].mxu0  ;;  %716 = vmatprep.mubr.bf16.mxu1 %v216_v18 }
  0xf8   :  { %v193_v24 = vadd.f32 %v691_v23, %v601_v40  ;;  %v184_v25 = vpop.f32.mrb[15].mxu0  ;;  %717 = vmatmul.mubr.bf16.gmra.mrb[8].mxu1 %v217_v17  ;;  %v210_v27 = vmax.f32 %v190_v20, 0.0 }
  0xf9   :  { %v185_v26 = vadd.f32 %v601_v40, %v184_v25  ;;  %v208_v29 = vmax.f32 %v182_v22, 0.0 }
  0xfa   :  { %v211_v28 = vmax.f32 %v193_v24, 0.0 }
  0xfb   :  { %v209_v30 = vmax.f32 %v185_v26, 0.0 }
  0xfc   :  { %v219_v31 = vpack.c.bf16 %v211_v28, %v210_v27  ;;  %v621_v28 = vld [vmem:[%s1003_s6] ss:$0 sm:$0xff] }
  0xfd   :  { %v218_v32 = vpack.c.bf16 %v209_v30, %v208_v29 }
  0xff   :  { %720 = vmatprep.mubr.bf16.mxu1 %v218_v32 }
 0x100   :  { %721 = vmatmul.mubr.bf16.gmra.mrb[12].mxu1 %v219_v31 }
 0x1bb   :  { %v710_v36 = vpop.f32.mrb[0].mxu1 }
 0x1bc   :  { %v334_v37 = vadd.f32 %v710_v36, %v612_v35  ;;  %v325_v38 = vpop.f32.mrb[1].mxu1 }
 0x1bd   :  { %v326_v39 = vadd.f32 %v612_v35, %v325_v38  ;;  %v711_v40 = vpop.f32.mrb[2].mxu1 }
 0x1be   :  { %v337_v41 = vadd.f32 %v711_v40, %v612_v35  ;;  %v328_v42 = vpop.f32.mrb[3].mxu1  ;;  %v390_v44 = vmax.f32 %v334_v37, 0.0 }
 0x1bf   :  { %v329_v43 = vadd.f32 %v612_v35, %v328_v42  ;;  %v388_v46 = vmax.f32 %v326_v39, 0.0 }
 0x1c0   :  { %v391_v45 = vmax.f32 %v337_v41, 0.0 }
 0x1c1   :  { %v389_v47 = vmax.f32 %v329_v43, 0.0 }
 0x1c2   :  { %v405_v48 = vpack.c.bf16 %v391_v45, %v390_v44 }
 0x1c3   :  { %v404_v49 = vpack.c.bf16 %v389_v47, %v388_v46  ;;  %v714_v50 = vpop.f32.mrb[4].mxu1 }
 0x1c4   :  { %v350_v51 = vadd.f32 %v714_v50, %v612_v35  ;;  %v341_v52 = vpop.f32.mrb[5].mxu1 }
 0x1c5   :  { %v342_v53 = vadd.f32 %v612_v35, %v341_v52  ;;  %v715_v54 = vpop.f32.mrb[6].mxu1  ;;  %740 = vmatprep.mubr.bf16.mxu0 %v404_v49 }
 0x1c6   :  { %v353_v55 = vadd.f32 %v715_v54, %v612_v35  ;;  %v344_v56 = vpop.f32.mrb[7].mxu1  ;;  %741 = vmatmul.mubr.bf16.vlgmr.msra.gmra.mrb[16].mxu0 %v405_v48  ;;  %v394_v58 = vmax.f32 %v350_v51, 0.0 }
 0x1c7   :  { %v345_v57 = vadd.f32 %v612_v35, %v344_v56  ;;  %v392_v60 = vmax.f32 %v342_v53, 0.0 }
 0x1c8   :  { %v395_v59 = vmax.f32 %v353_v55, 0.0 }
 0x1c9   :  { %v393_v61 = vmax.f32 %v345_v57, 0.0 }
 0x1ca   :  { %v407_v62 = vpack.c.bf16 %v395_v59, %v394_v58 }
 0x1cb   :  { %v406_v63 = vpack.c.bf16 %v393_v61, %v392_v60  ;;  %v718_v0 = vpop.f32.mrb[8].mxu1 }
 0x1cc   :  { %v366_v1 = vadd.f32 %v718_v0, %v612_v35  ;;  %v357_v2 = vpop.f32.mrb[9].mxu1 }
 0x1cd   :  { %v358_v3 = vadd.f32 %v612_v35, %v357_v2  ;;  %v719_v4 = vpop.f32.mrb[10].mxu1  ;;  %744 = vmatprep.mubr.bf16.mxu0 %v406_v63 }
 0x1ce   :  { %v369_v5 = vadd.f32 %v719_v4, %v612_v35  ;;  %v360_v6 = vpop.f32.mrb[11].mxu1  ;;  %745 = vmatmul.mubr.bf16.gmra.mrb[20].mxu0 %v407_v62  ;;  %v398_v8 = vmax.f32 %v366_v1, 0.0 }
 0x1cf   :  { %v361_v7 = vadd.f32 %v612_v35, %v360_v6  ;;  %v396_v10 = vmax.f32 %v358_v3, 0.0 }
 0x1d0   :  { %v399_v9 = vmax.f32 %v369_v5, 0.0 }
 0x1d1   :  { %v397_v11 = vmax.f32 %v361_v7, 0.0 }
 0x1d2   :  { %v409_v12 = vpack.c.bf16 %v399_v9, %v398_v8 }
 0x1d3   :  { %v408_v13 = vpack.c.bf16 %v397_v11, %v396_v10  ;;  %v722_v14 = vpop.f32.mrb[12].mxu1 }
 0x1d4   :  { %v382_v15 = vadd.f32 %v722_v14, %v612_v35  ;;  %v373_v16 = vpop.f32.mrb[13].mxu1 }
 0x1d5   :  { %v374_v17 = vadd.f32 %v612_v35, %v373_v16  ;;  %v723_v18 = vpop.f32.mrb[14].mxu1  ;;  %748 = vmatprep.mubr.bf16.mxu0 %v408_v13 }
 0x1d6   :  { %v385_v19 = vadd.f32 %v723_v18, %v612_v35  ;;  %v376_v20 = vpop.f32.mrb[15].mxu1  ;;  %749 = vmatmul.mubr.bf16.gmra.mrb[24].mxu0 %v409_v12  ;;  %v402_v22 = vmax.f32 %v382_v15, 0.0 }
 0x1d7   :  { %v377_v21 = vadd.f32 %v612_v35, %v376_v20  ;;  %v400_v24 = vmax.f32 %v374_v17, 0.0 }
 0x1d8   :  { %v403_v23 = vmax.f32 %v385_v19, 0.0 }
 0x1d9   :  { %v401_v25 = vmax.f32 %v377_v21, 0.0 }
 0x1da   :  { %v411_v26 = vpack.c.bf16 %v403_v23, %v402_v22 }
 0x1db   :  { %v410_v27 = vpack.c.bf16 %v401_v25, %v400_v24 }
 0x1dd   :  { %752 = vmatprep.mubr.bf16.mxu0 %v410_v27 }
 0x1de   :  { %753 = vmatmul.mubr.bf16.gmra.mrb[28].mxu0 %v411_v26 }
 0x299   :  { %v742_v29 = vpop.f32.mrb[16].mxu0 }
 0x29a   :  { %v526_v30 = vadd.f32 %v742_v29, %v621_v28  ;;  %v517_v31 = vpop.f32.mrb[17].mxu0 }
 0x29b   :  { %v518_v32 = vadd.f32 %v621_v28, %v517_v31  ;;  %v743_v33 = vpop.f32.mrb[18].mxu0 }
 0x29c   :  { %583 = vst.msk [vmem:[%s1004_s7 + $0x10] sm:$0xff] %vm580_vm1, %v526_v30  ;;  %v529_v34 = vadd.f32 %v743_v33, %v621_v28  ;;  %v520_v35 = vpop.f32.mrb[19].mxu0 }
 0x29d   :  { %581 = vst.msk [vmem:[%s1004_s7] sm:$0xff] %vm580_vm1, %v518_v32  ;;  %v521_v36 = vadd.f32 %v621_v28, %v520_v35 }
 0x29e   :  { %584 = vst.msk [vmem:[%s1004_s7 + $0x18] sm:$0xff] %vm580_vm1, %v529_v34 }
 0x29f   :  { %582 = vst.msk [vmem:[%s1004_s7 + $0x8] sm:$0xff] %vm580_vm1, %v521_v36 }
 0x2a1   :  { %v746_v37 = vpop.f32.mrb[20].mxu0 }
 0x2a2   :  { %v542_v38 = vadd.f32 %v746_v37, %v621_v28  ;;  %v533_v39 = vpop.f32.mrb[21].mxu0 }
 0x2a3   :  { %v534_v40 = vadd.f32 %v621_v28, %v533_v39  ;;  %v747_v41 = vpop.f32.mrb[22].mxu0 }
 0x2a4   :  { %587 = vst.msk [vmem:[%s1004_s7 + $0x30] sm:$0xff] %vm580_vm1, %v542_v38  ;;  %v545_v42 = vadd.f32 %v747_v41, %v621_v28  ;;  %v536_v43 = vpop.f32.mrb[23].mxu0 }
 0x2a5   :  { %585 = vst.msk [vmem:[%s1004_s7 + $0x20] sm:$0xff] %vm580_vm1, %v534_v40  ;;  %v537_v44 = vadd.f32 %v621_v28, %v536_v43 }
 0x2a6   :  { %588 = vst.msk [vmem:[%s1004_s7 + $0x38] sm:$0xff] %vm580_vm1, %v545_v42 }
 0x2a7   :  { %586 = vst.msk [vmem:[%s1004_s7 + $0x28] sm:$0xff] %vm580_vm1, %v537_v44 }
 0x2a9   :  { %v750_v45 = vpop.f32.mrb[24].mxu0 }
 0x2aa   :  { %v558_v46 = vadd.f32 %v750_v45, %v621_v28  ;;  %v549_v47 = vpop.f32.mrb[25].mxu0 }
 0x2ab   :  { %v550_v48 = vadd.f32 %v621_v28, %v549_v47  ;;  %v751_v49 = vpop.f32.mrb[26].mxu0 }
 0x2ac   :  { %591 = vst.msk [vmem:[%s1004_s7 + $0x50] sm:$0xff] %vm580_vm1, %v558_v46  ;;  %v561_v50 = vadd.f32 %v751_v49, %v621_v28  ;;  %v552_v51 = vpop.f32.mrb[27].mxu0 }
 0x2ad   :  { %589 = vst.msk [vmem:[%s1004_s7 + $0x40] sm:$0xff] %vm580_vm1, %v550_v48  ;;  %v553_v52 = vadd.f32 %v621_v28, %v552_v51 }
 0x2ae   :  { %592 = vst.msk [vmem:[%s1004_s7 + $0x58] sm:$0xff] %vm580_vm1, %v561_v50 }
 0x2af   :  { %590 = vst.msk [vmem:[%s1004_s7 + $0x48] sm:$0xff] %vm580_vm1, %v553_v52 }
 0x2b1   :  { %v754_v53 = vpop.f32.mrb[28].mxu0 }
 0x2b2   :  { %v574_v54 = vadd.f32 %v754_v53, %v621_v28  ;;  %v565_v55 = vpop.f32.mrb[29].mxu0 }
 0x2b3   :  { %v566_v56 = vadd.f32 %v621_v28, %v565_v55  ;;  %v755_v57 = vpop.f32.mrb[30].mxu0 }
 0x2b4   :  { %595 = vst.msk [vmem:[%s1004_s7 + $0x70] sm:$0xff] %vm580_vm1, %v574_v54  ;;  %v577_v58 = vadd.f32 %v755_v57, %v621_v28  ;;  %v568_v59 = vpop.f32.mrb[31].mxu0 }
 0x2b5   :  { %593 = vst.msk [vmem:[%s1004_s7 + $0x60] sm:$0xff] %vm580_vm1, %v566_v56  ;;  %v569_v60 = vadd.f32 %v621_v28, %v568_v59 }
 0x2b6   :  { %596 = vst.msk [vmem:[%s1004_s7 + $0x78] sm:$0xff] %vm580_vm1, %v577_v58 }
 0x2b7   :  { %594 = vst.msk [vmem:[%s1004_s7 + $0x68] sm:$0xff] %vm580_vm1, %v569_v60 }

</bundles_post_ra>
